<compile_context>
chip_gen: v5e
topology: v5e:2x2
jax: 0.10.0
libtpu: 0.0.40
codegen_flags: <defaults>
</compile_context>

<pallas_src>
import numpy as np
import jax
import jax.numpy as jnp
from jax.experimental import pallas as pl
from jax.experimental.pallas import tpu as pltpu

# ----------------------- small, EEGNet-consistent hyper-parameters -----------------------
B = 2            # batch
C_EEG = 4        # args.num_channels (conv "height" in NCHW)
T = 16           # time length
F1 = 4           # args.F1
D_MULT = 2       # args.D
F2 = 8           # args.F2
K1 = 7           # args.k1 (odd -> 'same' padding is symmetric)
K2 = 7           # args.k2
P1 = 2           # args.p1
P2 = 2           # args.p2
NCLS = 4         # args.n_class
HILBERT = True   # args.hilbert_transform

DF1 = D_MULT * F1            # 8
T1 = T // P1                 # 8
T2 = T1 // P2                # 4
NDIM = F2 * 1 * T2           # == EEGNet.compute_dim(...)
PAD1 = (K1 - 1) // 2
PAD2 = (K2 - 1) // 2
EPS = 1e-5                   # BatchNorm eps

CT = C_EEG * T               # 64   flattened (channel x time) lanes of the input
CT1 = CT + 1                 # 65   + ones column (folds BN1 shift)
F1CT = F1 * C_EEG * T        # 256  lanes after conv1+Hilbert
DFT = DF1 * T                # 128  lanes after depthwise conv2
DFT1 = DF1 * T1              # 64
F2T1 = F2 * T1               # 64   lanes after pointwise conv (+BN3)

def _align(n, a=32):         # keep every slab block 32-row aligned (bf16 sublane packing)
    return ((n + a - 1) // a) * a

ROW_MRE = 0
ROW_MIM = _align(ROW_MRE + CT1)       # 96
ROW_W2R = _align(ROW_MIM + CT1)       # 192
ROW_M3 = _align(ROW_W2R + F1CT)       # 448
ROW_MCLS = _align(ROW_M3 + DFT)       # 576
SLAB_ROWS = _align(ROW_MCLS + F2T1)   # 640
SLAB_COLS = F1CT                      # 256


def _elu(x):
    # nn.ELU(alpha=1): x if x > 0 else exp(x) - 1     (kept in f32)
    return jnp.where(x > 0.0, x, jnp.exp(jnp.minimum(x, 0.0)) - 1.0)


# --------------------------------------- kernel ------------------------------------------
def eegnet_kernel(x_ref, ops_ref, bias_ref, out_ref):
    x = x_ref[...]                                                   # (B, 65) bf16

    # conv1 + BN1 (shift folded via the ones column) composed with the analytic-signal op
    re = jnp.dot(x, ops_ref[ROW_MRE:ROW_MRE + CT1, :],
                 preferred_element_type=jnp.float32)                 # (B, 256) f32
    if HILBERT:
        im = jnp.dot(x, ops_ref[ROW_MIM:ROW_MIM + CT1, :],
                     preferred_element_type=jnp.float32)             # (B, 256) f32
        h1 = jnp.sqrt(re * re + im * im)                             # |analytic|
    else:
        h1 = re

    # depthwise conv2 over EEG channels (+BN2 scale) as one right matmul; BN2 shift; ELU
    z2 = jnp.dot(h1.astype(jnp.bfloat16), ops_ref[ROW_W2R:ROW_W2R + F1CT, 0:DFT],
                 preferred_element_type=jnp.float32)                 # (B, 128)
    e2 = _elu(z2 + bias_ref[0:1, 0:DFT])

    # AvgPool(1,p1) ∘ depthwise conv3 ('same') ∘ pointwise 1x1 (+BN3 scale), fused; ELU
    y3 = jnp.dot(e2.astype(jnp.bfloat16), ops_ref[ROW_M3:ROW_M3 + DFT, 0:F2T1],
                 preferred_element_type=jnp.float32)                 # (B, 64)
    e3 = _elu(y3 + bias_ref[1:2, 0:F2T1])

    # AvgPool(1,p2) + flatten + Linear, fused
    logits = jnp.dot(e3.astype(jnp.bfloat16), ops_ref[ROW_MCLS:ROW_MCLS + F2T1, 0:NCLS],
                     preferred_element_type=jnp.float32)             # (B, NCLS)
    out_ref[...] = logits + bias_ref[2:3, 0:NCLS]


# --------------------------------------- wrapper -----------------------------------------
@jax.jit
def eegnet_forward(x_nchw, ops_slab, bias_slab):
    xf = x_nchw[:, 0, :, :].reshape(B, CT)                           # (B, C*T)
    x_aug = jnp.concatenate([xf, jnp.ones((B, 1), xf.dtype)], axis=1).astype(jnp.bfloat16)
    return pl.pallas_call(
        eegnet_kernel,
        out_shape=jax.ShapeDtypeStruct((B, NCLS), jnp.float32),
        in_specs=[pl.BlockSpec(memory_space=pltpu.MemorySpace.VMEM)] * 3,
        out_specs=pl.BlockSpec(memory_space=pltpu.MemorySpace.VMEM),
    )(x_aug, ops_slab, bias_slab)


# ------------------------------ deterministic parameter setup ----------------------------
def make_params(key):
    ks = jax.random.split(key, 9)
    w1 = 0.3 * jax.random.normal(ks[0], (F1, 1, 1, K1), jnp.float32)
    w2 = 0.3 * jax.random.normal(ks[1], (DF1, 1, C_EEG, 1), jnp.float32)
    w3 = 0.3 * jax.random.normal(ks[2], (DF1, 1, 1, K2), jnp.float32)
    wp = 0.3 * jax.random.normal(ks[3], (F2, DF1, 1, 1), jnp.float32)
    wl = 0.3 * jax.random.normal(ks[4], (NCLS, NDIM), jnp.float32)
    bl = 0.1 * jax.random.normal(ks[5], (NCLS,), jnp.float32)

    def bn(k, n):
        a, b, c, d = jax.random.split(k, 4)
        gamma = 1.0 + 0.1 * jax.random.normal(a, (n,), jnp.float32)
        beta = 0.1 * jax.random.normal(b, (n,), jnp.float32)
        mean = 0.1 * jax.random.normal(c, (n,), jnp.float32)
        var = 0.5 + jax.random.uniform(d, (n,), jnp.float32)
        return gamma, beta, mean, var

    return dict(w1=w1, w2=w2, w3=w3, wp=wp, wl=wl, bl=bl,
                bn1=bn(ks[6], F1), bn2=bn(ks[7], DF1), bn3=bn(ks[8], F2))


def pack_kernel_params(p):
    """Fold BN (eval mode) + Hilbert + pooling + flatten into right operators and pack
    them into one bf16 operator slab and one f32 bias slab."""
    def fold(bn):
        g, b, m, v = (np.asarray(a, np.float64) for a in bn)
        sc = g / np.sqrt(v + EPS)
        return sc, b - m * sc

    sc1, sh1 = fold(p["bn1"])
    sc2, sh2 = fold(p["bn2"])
    sc3, sh3 = fold(p["bn3"])

    w1_eff = np.asarray(p["w1"][:, 0, 0, :], np.float64) * sc1[:, None]   # (F1, K1)
    w2_eff = np.asarray(p["w2"][:, 0, :, 0], np.float64) * sc2[:, None]   # (DF1, C)
    w3 = np.asarray(p["w3"][:, 0, 0, :], np.float64)                      # (DF1, K2)
    wp_eff = np.asarray(p["wp"][:, :, 0, 0], np.float64) * sc3[:, None]   # (F2, DF1)
    wl = np.asarray(p["wl"], np.float64)                                  # (NCLS, NDIM)
    bl = np.asarray(p["bl"], np.float64)                                  # (NCLS,)

    # exact dense analytic-signal (Hilbert) operator applied on the right: a = y @ M
    n = T
    idx = np.arange(n)
    Fm = np.exp(-2j * np.pi * np.outer(idx, idx) / n)
    h = np.zeros(n)
    h[0] = 1.0
    h[1:(n + 1) // 2] = 2.0
    if n % 2 == 0:
        h[n // 2] = 1.0
    Mh = Fm @ np.diag(h) @ (np.conj(Fm) / n)
    if HILBERT:
        reM, imM = np.real(Mh), np.imag(Mh)
    else:
        reM, imM = np.eye(T), np.zeros((T, T))

    def toeplitz(wrow, K, pad, length):
        Tm = np.zeros((length, length))
        for t_in in range(length):
            for t_out in range(length):
                k = t_in - t_out + pad
                if 0 <= k < K:
                    Tm[t_in, t_out] = wrow[k]
        return Tm

    ones_t = np.ones(T)

    # stage 1: conv1 (+BN1) ∘ Hilbert as (C*T+1, F1*C*T) right operators (bias row last)
    Mre = np.zeros((CT1, F1CT))
    Mim = np.zeros((CT1, F1CT))
    for f in range(F1):
        Tf = toeplitz(w1_eff[f], K1, PAD1, T)
        TfR, TfI = Tf @ reM, Tf @ imM
        bR, bI = sh1[f] * (ones_t @ reM), sh1[f] * (ones_t @ imM)
        for c in range(C_EEG):
            col = f * C_EEG * T + c * T
            Mre[c * T:(c + 1) * T, col:col + T] = TfR
            Mim[c * T:(c + 1) * T, col:col + T] = TfI
            Mre[CT, col:col + T] = bR
            Mim[CT, col:col + T] = bI

    # stage 2: depthwise conv2 over channels (+BN2 scale) as (F1*C*T, DF1*T)
    W2R = np.zeros((F1CT, DFT))
    for o in range(DF1):
        f = o // D_MULT
        for c in range(C_EEG):
            for t in range(T):
                W2R[f * C_EEG * T + c * T + t, o * T + t] = w2_eff[o, c]
    s2row = np.repeat(sh2, T)                                             # (DFT,)

    # stage 3: AvgPool(1,p1) ∘ depthwise conv3 ('same') ∘ pointwise (+BN3 scale)
    P1M = np.zeros((DFT, DFT1))
    for o in range(DF1):
        for t in range(T):
            P1M[o * T + t, o * T1 + t // P1] = 1.0 / P1
    C3 = np.zeros((DFT1, DFT1))
    for o in range(DF1):
        C3[o * T1:(o + 1) * T1, o * T1:(o + 1) * T1] = toeplitz(w3[o], K2, PAD2, T1)
    PW = np.zeros((DFT1, F2T1))
    for j in range(F2):
        for o in range(DF1):
            for t in range(T1):
                PW[o * T1 + t, j * T1 + t] = wp_eff[j, o]
    M3 = P1M @ C3 @ PW                                                    # (DFT, F2T1)
    s3row = np.repeat(sh3, T1)                                            # (F2T1,)

    # stage 4: AvgPool(1,p2) + flatten + Linear as (F2*T1, NCLS)
    Mcls = np.zeros((F2T1, NCLS))
    for j in range(F2):
        for t1 in range(T1):
            for c in range(NCLS):
                Mcls[j * T1 + t1, c] = wl[c, j * T2 + t1 // P2] / P2

    # pack: one bf16 operator slab (MXU operands) + one tiny f32 bias slab
    slab = np.zeros((SLAB_ROWS, SLAB_COLS))
    slab[ROW_MRE:ROW_MRE + CT1, :F1CT] = Mre
    slab[ROW_MIM:ROW_MIM + CT1, :F1CT] = Mim
    slab[ROW_W2R:ROW_W2R + F1CT, :DFT] = W2R
    slab[ROW_M3:ROW_M3 + DFT, :F2T1] = M3
    slab[ROW_MCLS:ROW_MCLS + F2T1, :NCLS] = Mcls

    biases = np.zeros((8, 128))
    biases[0, :DFT] = s2row
    biases[1, :F2T1] = s3row
    biases[2, :NCLS] = bl

    return jnp.asarray(slab, jnp.bfloat16), jnp.asarray(biases, jnp.float32)


# --------------------------- pure-JAX reference (for validation) -------------------------
def eegnet_reference(x_nchw, p):
    dn = ("NCHW", "OIHW", "NCHW")

    def bn(y, prm):
        g, b, m, v = prm
        rs = lambda a: a[None, :, None, None]
        return (y - rs(m)) / jnp.sqrt(rs(v) + EPS) * rs(g) + rs(b)

    y = jax.lax.conv_general_dilated(x_nchw, p["w1"], (1, 1),
                                     [(0, 0), (PAD1, PAD1)], dimension_numbers=dn)
    y = bn(y, p["bn1"])
    if HILBERT:
        Xf = jnp.fft.fft(y, axis=-1)
        h = np.zeros(T)
        h[0] = 1.0
        h[1:(T + 1) // 2] = 2.0
        if T % 2 == 0:
            h[T // 2] = 1.0
        y = jnp.abs(jnp.fft.ifft(Xf * jnp.asarray(h, jnp.complex64), axis=-1))
    y = jax.lax.conv_general_dilated(y, p["w2"], (1, 1), [(0, 0), (0, 0)],
                                     dimension_numbers=dn, feature_group_count=F1)
    y = bn(y, p["bn2"])
    y = jax.nn.elu(y)
    y = y.reshape(B, DF1, 1, T1, P1).mean(-1)
    y = jax.lax.conv_general_dilated(y, p["w3"], (1, 1), [(0, 0), (PAD2, PAD2)],
                                     dimension_numbers=dn, feature_group_count=DF1)
    y = jax.lax.conv_general_dilated(y, p["wp"], (1, 1), [(0, 0), (0, 0)],
                                     dimension_numbers=dn)
    y = bn(y, p["bn3"])
    y = jax.nn.elu(y)
    y = y.reshape(B, F2, 1, T2, P2).mean(-1)
    feat = y.reshape(B, NDIM)
    return feat @ p["wl"].T + p["bl"]


# ------------------------------------------ main -----------------------------------------
if __name__ == "__main__":
    key = jax.random.PRNGKey(0)
    kx, kp = jax.random.split(key)
    x = jax.random.normal(kx, (B, 1, C_EEG, T), jnp.float32)   # NCHW like PyTorch

    raw = make_params(kp)
    ops_slab, bias_slab = pack_kernel_params(raw)

    out = jax.block_until_ready(eegnet_forward(x, ops_slab, bias_slab))
    ref = jax.block_until_ready(eegnet_reference(x, raw))

    assert out.shape == (B, NCLS)
    err = float(jnp.max(jnp.abs(out - ref)))
    scale = float(jnp.max(jnp.abs(ref))) + 1e-6
    assert err <= 5e-2 * scale + 5e-3, f"kernel/reference mismatch: max|d|={err}, scale={scale}"
    print("KERNEL_OK")
</pallas_src>

<mosaic_0001>
module attributes {stable_mosaic.version = 11 : i64} {
  func.func @eegnet_kernel(%arg0: memref<2x65xbf16, #tpu.memory_space<vmem>>, %arg1: memref<640x256xbf16, #tpu.memory_space<vmem>>, %arg2: memref<8x128xf32, #tpu.memory_space<vmem>>, %arg3: memref<2x4xf32, #tpu.memory_space<vmem>>) attributes {dimension_semantics = [], scalar_prefetch = 0 : i64, scratch_operands = 0 : i64, tpu.core_type = #tpu.core_type<tc>} {
    %c0 = arith.constant 0 : index
    %c0_0 = arith.constant 0 : index
    %0 = vector.load %arg0[%c0, %c0_0] : memref<2x65xbf16, #tpu.memory_space<vmem>>, vector<2x65xbf16>
    %c0_1 = arith.constant 0 : index
    %c0_2 = arith.constant 0 : index
    %1 = vector.load %arg1[%c0_1, %c0_2] : memref<640x256xbf16, #tpu.memory_space<vmem>>, vector<65x256xbf16>
    %cst = arith.constant dense<0.000000e+00> : vector<2x256xf32>
    %2 = tpu.matmul %0, %1, %cst {dimension_numbers = #tpu.dot_dimension_numbers<[1], [0], [0], [1], [0, 0, 1, 1], [], []>} : vector<2x65xbf16>, vector<65x256xbf16>, vector<2x256xf32> -> vector<2x256xf32>
    %c96 = arith.constant 96 : index
    %c0_3 = arith.constant 0 : index
    %3 = vector.load %arg1[%c96, %c0_3] : memref<640x256xbf16, #tpu.memory_space<vmem>>, vector<65x256xbf16>
    %cst_4 = arith.constant dense<0.000000e+00> : vector<2x256xf32>
    %4 = tpu.matmul %0, %3, %cst_4 {dimension_numbers = #tpu.dot_dimension_numbers<[1], [0], [0], [1], [0, 0, 1, 1], [], []>} : vector<2x65xbf16>, vector<65x256xbf16>, vector<2x256xf32> -> vector<2x256xf32>
    %5 = arith.mulf %2, %2 : vector<2x256xf32>
    %6 = arith.mulf %4, %4 : vector<2x256xf32>
    %7 = arith.addf %5, %6 : vector<2x256xf32>
    %8 = math.sqrt %7 : vector<2x256xf32>
    %9 = arith.truncf %8 : vector<2x256xf32> to vector<2x256xbf16>
    %c192 = arith.constant 192 : index
    %c0_5 = arith.constant 0 : index
    %10 = vector.load %arg1[%c192, %c0_5] : memref<640x256xbf16, #tpu.memory_space<vmem>>, vector<256x128xbf16>
    %cst_6 = arith.constant dense<0.000000e+00> : vector<2x128xf32>
    %11 = tpu.matmul %9, %10, %cst_6 {dimension_numbers = #tpu.dot_dimension_numbers<[1], [0], [0], [1], [0, 0, 1, 1], [], []>} : vector<2x256xbf16>, vector<256x128xbf16>, vector<2x128xf32> -> vector<2x128xf32>
    %c0_7 = arith.constant 0 : index
    %c0_8 = arith.constant 0 : index
    %12 = vector.load %arg2[%c0_7, %c0_8] : memref<8x128xf32, #tpu.memory_space<vmem>>, vector<1x128xf32>
    %13 = vector.broadcast %12 : vector<1x128xf32> to vector<2x128xf32>
    %14 = arith.addf %11, %13 : vector<2x128xf32>
    %cst_9 = arith.constant 0.000000e+00 : f32
    %15 = vector.broadcast %cst_9 : f32 to vector<2x128xf32>
    %16 = arith.cmpf ogt, %14, %15 : vector<2x128xf32>
    %cst_10 = arith.constant 0.000000e+00 : f32
    %17 = vector.broadcast %cst_10 : f32 to vector<2x128xf32>
    %18 = arith.minimumf %14, %17 : vector<2x128xf32>
    %19 = math.exp %18 : vector<2x128xf32>
    %cst_11 = arith.constant 1.000000e+00 : f32
    %20 = vector.broadcast %cst_11 : f32 to vector<2x128xf32>
    %21 = arith.subf %19, %20 : vector<2x128xf32>
    %22 = arith.select %16, %14, %21 : vector<2x128xi1>, vector<2x128xf32>
    %23 = arith.truncf %22 : vector<2x128xf32> to vector<2x128xbf16>
    %c448 = arith.constant 448 : index
    %c0_12 = arith.constant 0 : index
    %24 = vector.load %arg1[%c448, %c0_12] : memref<640x256xbf16, #tpu.memory_space<vmem>>, vector<128x64xbf16>
    %cst_13 = arith.constant dense<0.000000e+00> : vector<2x64xf32>
    %25 = tpu.matmul %23, %24, %cst_13 {dimension_numbers = #tpu.dot_dimension_numbers<[1], [0], [0], [1], [0, 0, 1, 1], [], []>} : vector<2x128xbf16>, vector<128x64xbf16>, vector<2x64xf32> -> vector<2x64xf32>
    %c1 = arith.constant 1 : index
    %c0_14 = arith.constant 0 : index
    %26 = vector.load %arg2[%c1, %c0_14] : memref<8x128xf32, #tpu.memory_space<vmem>>, vector<1x64xf32>
    %27 = vector.broadcast %26 : vector<1x64xf32> to vector<2x64xf32>
    %28 = arith.addf %25, %27 : vector<2x64xf32>
    %cst_15 = arith.constant 0.000000e+00 : f32
    %29 = vector.broadcast %cst_15 : f32 to vector<2x64xf32>
    %30 = arith.cmpf ogt, %28, %29 : vector<2x64xf32>
    %cst_16 = arith.constant 0.000000e+00 : f32
    %31 = vector.broadcast %cst_16 : f32 to vector<2x64xf32>
    %32 = arith.minimumf %28, %31 : vector<2x64xf32>
    %33 = math.exp %32 : vector<2x64xf32>
    %cst_17 = arith.constant 1.000000e+00 : f32
    %34 = vector.broadcast %cst_17 : f32 to vector<2x64xf32>
    %35 = arith.subf %33, %34 : vector<2x64xf32>
    %36 = arith.select %30, %28, %35 : vector<2x64xi1>, vector<2x64xf32>
    %37 = arith.truncf %36 : vector<2x64xf32> to vector<2x64xbf16>
    %c576 = arith.constant 576 : index
    %c0_18 = arith.constant 0 : index
    %38 = vector.load %arg1[%c576, %c0_18] : memref<640x256xbf16, #tpu.memory_space<vmem>>, vector<64x4xbf16>
    %cst_19 = arith.constant dense<0.000000e+00> : vector<2x4xf32>
    %39 = tpu.matmul %37, %38, %cst_19 {dimension_numbers = #tpu.dot_dimension_numbers<[1], [0], [0], [1], [0, 0, 1, 1], [], []>} : vector<2x64xbf16>, vector<64x4xbf16>, vector<2x4xf32> -> vector<2x4xf32>
    %c2 = arith.constant 2 : index
    %c0_20 = arith.constant 0 : index
    %40 = vector.load %arg2[%c2, %c0_20] : memref<8x128xf32, #tpu.memory_space<vmem>>, vector<1x4xf32>
    %41 = vector.broadcast %40 : vector<1x4xf32> to vector<2x4xf32>
    %42 = arith.addf %39, %41 : vector<2x4xf32>
    %c0_21 = arith.constant 0 : index
    %c0_22 = arith.constant 0 : index
    %43 = vector.load %arg3[%c0_21, %c0_22] : memref<2x4xf32, #tpu.memory_space<vmem>>, vector<2x4xf32>
    tpu.vector_store %arg3[%c0_21, %c0_22], %42 {strides = array<i32>} : memref<2x4xf32, #tpu.memory_space<vmem>>, vector<2x4xf32>,
    return
  }
}

</mosaic_0001>

<bundles_post_ra>
// kernel: squeeze.0
= control target key start
LH: loop header
LB: loop body
LE: loop exit
PB: predicated region body
PF: predicated region fallthrough
CT: control target
= control target key end

     0   :  { %s51_s8 = smov 3  ;;  %s68_s9 = smov 48   ;;  %vm34_vm0 = vcmask 130048   ;;  %vm41_vm1 = vcmask 523648   ;;  %vm48_vm2 = vcmask 392448   ;;  %vm55_vm3 = vcmask 261248   ;;  %s87_s0 = inlined_call_operand.vmem [shape: bf16[2,1,4,16], index: 0, kind: input, shape index: {}]   ;;  %s88_s1 = inlined_call_operand.vmem [shape: bf16[2,64], index: 1, kind: output, shape index: {}]  }
   0x1   :  { %v64_v0 = vld [vmem:[%s87_s0] sm:$0xf]   ;;  %s37_s0 = smov 3  ;;  %s69_s10 = smov 16  }
   0x2   :  { %v15_v1 = vunpack.c.l.bf16 %v64_v0  ;;  %s44_s11 = smov 3  ;;  %s70_s12 = smov 32  }
   0x3   :  { %s32_s13 = smov 3 }
   0x4   :  { %18 = vst [vmem:[#allocation1 + $0x4] sm:$0xf0] %v15_v1 }
   0x5   :  { %31 = vst [vmem:[#allocation1] sm:$0xf] %v15_v1 }
   0xc   :  { %v38_v2 = vld [vmem:[#allocation1 + $0x3] ss:$8 sm:%s37_s0]   ;;  %v52_v3 = vld [vmem:[#allocation1 + $0x1] ss:$8 sm:%s51_s8]   ;;  %v45_v4 = vld [vmem:[#allocation1 + $0x2] ss:$8 sm:%s44_s11]  }
   0xd   :  { %39 = vrot.lane.b32.xlu0 %v38_v2, %s68_s9  ;;  %53 = vrot.lane.b32.xlu1 %v52_v3, %s69_s10  ;;  %v33_v5 = vld [vmem:[#allocation1] ss:$8 sm:%s32_s13]  }
   0xe   :  { %35 = vst.msk [vmem:[#allocation0] sm:$0x3] %vm34_vm0, %v33_v5  }
  0x15   :  { %46 = vrot.lane.b32.xlu0 %v45_v4, %s70_s12 }
  0x7f   :  { %v40_v6 = vpop.permute.xlu0 %39   ;;  %v54_v7 = vpop.permute.xlu1 %53  }
  0x80   :  { %42 = vst.msk [vmem:[#allocation0] sm:$0x3] %vm41_vm1, %v40_v6  }
  0x87   :  { %v47_v8 = vpop.permute.xlu0 %46  }
  0x88   :  { %49 = vst.msk [vmem:[#allocation0] sm:$0x3] %vm48_vm2, %v47_v8  }
  0x89   :  { %56 = vst.msk [vmem:[#allocation0] sm:$0x3] %vm55_vm3, %v54_v7  }
  0x90   :  { %v59_v9 = vld [vmem:[#allocation0] sm:$0x3] }
  0x91   :  { %v60_v10 = vpack.c.bf16 0.0, %v59_v9 }
  0x93   :  { %63 = vst [vmem:[%s88_s1] sm:$0x1] %v60_v10 }

// kernel: eegnet_forward.1
= control target key start
LH: loop header
LB: loop body
LE: loop exit
PB: predicated region body
PF: predicated region fallthrough
CT: control target
= control target key end

     0   :  { %8 = vsyncpa [#allocation3], 0  ;;  %s901_s0 = inlined_call_operand.vmem [shape: bf16[2,65], index: 0, kind: input, shape index: {}]   ;;  %s902_s1 = inlined_call_operand.hbm [shape: bf16[640,256], index: 1, kind: input, shape index: {}]   ;;  %s903_s2 = inlined_call_operand.vmem [shape: f32[8,128], index: 2, kind: input, shape index: {}]   ;;  %s904_s3 = inlined_call_operand.hbm [shape: f32[2,4], index: 3, kind: output, shape index: {}]  }
   0x1   :  { %9 = vsyncpa [#allocation4], 0  ;;  %s16_s14 = sshll.u32 %s902_s1, 4  ;;  %s858_s15 = smov [#allocation2]   ;;  %s17_s14 = int_to_ptr.hbm [resolvable:$true] %s16_s14 }
   0x2   :  { %s18_s16 = sshll.u32 %s858_s15, 4  ;;  %s859_s17 = smov 128   ;;  %s19_s16 = int_to_ptr.vmem [resolvable:$true] %s18_s16 }
   0x3   :  { %s860_s18 = smov 8  }
   0x4   :  { %24 = dma.hbm_to_vmem [thread:$0]  %s17_s14, 10240, %s19_s16, [#allocation3], %s859_s17, %s859_s17, %s860_s18  }
   0x5   :  { %854 = dma.done.wait [#allocation3], 10240  }
   0x6   :  { %855 = vsyncadd [#allocation3], 4294957056  ;;  %vm91_vm0 = vcmask 1040384   ;;  %v41_v0 = vld [vmem:[#allocation2 + $0x40] sm:$0x11]  ;;  %v861_v6 = vmov 0  }
   0x7   :  { %v134_v1 = vld [vmem:[#allocation2 + $0xa0] sm:$0x11]  ;;  %v67_v2 = vunpack.c.l.b16 %v41_v0  ;;  %v68_v3 = vunpack.c.h.b16 %v41_v0  ;;  %v93_v7 = vsel %vm91_vm0, 65535, %v861_v6  ;;  %v589_v12 = vld [vmem:[#allocation2 + $0x30] sm:$0xf]  ;;  %vm87_vm1 = vcmask 531456  }
   0x8   :  { %v160_v4 = vunpack.c.l.b16 %v134_v1  ;;  %v161_v5 = vunpack.c.h.b16 %v134_v1  ;;  %v753_v13 = vld [vmem:[#allocation2 + $0x34] sm:$0xf0]  ;;  %v752_v14 = vld [vmem:[#allocation2 + $0x34] sm:$0xf]  ;;  %v591_v15 = vld [vmem:[#allocation2 + $0x38] sm:$0xf0] }
   0x9   :  { %v77_v8 = vpack.c.b16 %v67_v2, %v67_v2  ;;  %v78_v9 = vpack.c.b16 %v68_v3, %v68_v3  ;;  %v623_v16 = vld [vmem:[#allocation2 + $0x90] sm:$0xf]  ;;  %v761_v21 = vld [vmem:[#allocation2 + $0x94] sm:$0xf0]  ;;  %v760_v22 = vld [vmem:[#allocation2 + $0x94] sm:$0xf]  ;;  %v590_v24 = vor.u32 %v753_v13, %v589_v12  ;;  %v594_v25 = vor.u32 %v752_v14, %v591_v15 }
   0xa   :  { %v170_v10 = vpack.c.b16 %v160_v4, %v160_v4  ;;  %v171_v11 = vpack.c.b16 %v161_v5, %v161_v5  ;;  %v625_v23 = vld [vmem:[#allocation2 + $0x98] sm:$0xf0]  ;;  %v581_v26 = vld [vmem:[#allocation2 + $0x20] sm:$0xf]  ;;  %v751_v27 = vld [vmem:[#allocation2 + $0x24] sm:$0xf0]  ;;  %v624_v28 = vor.u32 %v761_v21, %v623_v16 }
   0xb   :  { %v95_v17 = vand.u32 %v93_v7, %v77_v8  ;;  %v98_v18 = vand.u32 %v93_v7, %v78_v9  ;;  %v628_v29 = vor.u32 %v760_v22, %v625_v23  ;;  %v750_v30 = vld [vmem:[#allocation2 + $0x24] sm:$0xf]  ;;  %v583_v31 = vld [vmem:[#allocation2 + $0x28] sm:$0xf0]  ;;  %v615_v32 = vld [vmem:[#allocation2 + $0x80] sm:$0xf]  ;;  %v582_v38 = vor.u32 %v751_v27, %v581_v26 }
   0xc   :  { %v181_v19 = vand.u32 %v170_v10, %v93_v7  ;;  %v184_v20 = vand.u32 %v171_v11, %v93_v7  ;;  %v759_v33 = vld [vmem:[#allocation2 + $0x84] sm:$0xf0]  ;;  %v758_v34 = vld [vmem:[#allocation2 + $0x84] sm:$0xf]  ;;  %v617_v35 = vld [vmem:[#allocation2 + $0x88] sm:$0xf0]  ;;  %v586_v39 = vor.u32 %v750_v30, %v583_v31 }
   0xd   :  { %103 = vmatpush.bf16.msra.mxu0 %v95_v17  ;;  %116 = vmatpush.bf16.msra.mxu1 %v98_v18  ;;  %v573_v36 = vld [vmem:[#allocation2 + $0x10] sm:$0xf]  ;;  %v749_v37 = vld [vmem:[#allocation2 + $0x14] sm:$0xf0]  ;;  %v748_v40 = vld [vmem:[#allocation2 + $0x14] sm:$0xf]  ;;  %v616_v42 = vor.u32 %v759_v33, %v615_v32  ;;  %v620_v43 = vor.u32 %v758_v34, %v617_v35 }
   0xe   :  { %189 = vmatpush.bf16.msra.mxu2 %v181_v19  ;;  %202 = vmatpush.bf16.msra.mxu3 %v184_v20  ;;  %v575_v41 = vld [vmem:[#allocation2 + $0x18] sm:$0xf0]  ;;  %v607_v44 = vld [vmem:[#allocation2 + $0x70] sm:$0xf]  ;;  %v757_v45 = vld [vmem:[#allocation2 + $0x74] sm:$0xf0]  ;;  %v574_v48 = vor.u32 %v749_v37, %v573_v36 }
   0xf   :  { %v756_v46 = vld [vmem:[#allocation2 + $0x74] sm:$0xf]  ;;  %v609_v47 = vld [vmem:[#allocation2 + $0x78] sm:$0xf0]  ;;  %v578_v49 = vor.u32 %v748_v40, %v575_v41  ;;  %v565_v50 = vld [vmem:[#allocation2] sm:$0xf]  ;;  %v608_v52 = vor.u32 %v757_v45, %v607_v44 }
  0x10   :  { %v747_v51 = vld [vmem:[#allocation2 + $0x4] sm:$0xf0]  ;;  %v612_v53 = vor.u32 %v756_v46, %v609_v47  ;;  %v746_v54 = vld [vmem:[#allocation2 + $0x4] sm:$0xf]  ;;  %v567_v55 = vld [vmem:[#allocation2 + $0x8] sm:$0xf0] }
  0x11   :  { %104 = vmatpush.bf16.msra.mxu0 %v590_v24  ;;  %117 = vmatpush.bf16.msra.mxu1 %v594_v25  ;;  %v599_v56 = vld [vmem:[#allocation2 + $0x60] sm:$0xf]  ;;  %v755_v57 = vld [vmem:[#allocation2 + $0x64] sm:$0xf0]  ;;  %v754_v58 = vld [vmem:[#allocation2 + $0x64] sm:$0xf]  ;;  %v566_v60 = vor.u32 %v747_v51, %v565_v50  ;;  %v570_v61 = vor.u32 %v746_v54, %v567_v55 }
  0x12   :  { %190 = vmatpush.bf16.msra.mxu2 %v624_v28  ;;  %203 = vmatpush.bf16.msra.mxu3 %v628_v29  ;;  %v601_v59 = vld [vmem:[#allocation2 + $0x68] sm:$0xf0]  ;;  %v600_v62 = vor.u32 %v755_v57, %v599_v56  ;;  %v32_v0 = vld [vmem:[%s901_s0] sm:$0x1]  ;;  %v661_v1 = vld [vmem:[#allocation2 + $0x130] sm:$0xf] }
  0x13   :  { %v604_v63 = vor.u32 %v754_v58, %v601_v59  ;;  %v769_v2 = vld [vmem:[#allocation2 + $0x134] sm:$0xf0]  ;;  %v693_v3 = vld [vmem:[#allocation2 + $0x1b0] sm:$0xf]  ;;  %v657_v7 = vld [vmem:[#allocation2 + $0x120] sm:$0xf] }
  0x14   :  { %v662_v4 = vor.u32 %v769_v2, %v661_v1  ;;  %v777_v5 = vld [vmem:[#allocation2 + $0x1b4] sm:$0xf0]  ;;  %v768_v8 = vld [vmem:[#allocation2 + $0x124] sm:$0xf0]  ;;  %v689_v9 = vld [vmem:[#allocation2 + $0x1a0] sm:$0xf] }
  0x15   :  { %105 = vmatpush.bf16.msra.mxu0 %v582_v38  ;;  %118 = vmatpush.bf16.msra.mxu1 %v586_v39  ;;  %v694_v6 = vor.u32 %v777_v5, %v693_v3  ;;  %v658_v10 = vor.u32 %v768_v8, %v657_v7  ;;  %v776_v11 = vld [vmem:[#allocation2 + $0x1a4] sm:$0xf0]  ;;  %v653_v13 = vld [vmem:[#allocation2 + $0x110] sm:$0xf]  ;;  %v767_v14 = vld [vmem:[#allocation2 + $0x114] sm:$0xf0] }
  0x16   :  { %191 = vmatpush.bf16.msra.mxu2 %v616_v42  ;;  %204 = vmatpush.bf16.msra.mxu3 %v620_v43  ;;  %v690_v12 = vor.u32 %v776_v11, %v689_v9  ;;  %v685_v15 = vld [vmem:[#allocation2 + $0x190] sm:$0xf]  ;;  %v654_v16 = vor.u32 %v767_v14, %v653_v13  ;;  %v775_v17 = vld [vmem:[#allocation2 + $0x194] sm:$0xf0]  ;;  %v649_v19 = vld [vmem:[#allocation2 + $0x100] sm:$0xf] }
  0x17   :  { %v686_v18 = vor.u32 %v775_v17, %v685_v15  ;;  %v766_v20 = vld [vmem:[#allocation2 + $0x104] sm:$0xf0]  ;;  %v681_v21 = vld [vmem:[#allocation2 + $0x180] sm:$0xf]  ;;  %v645_v24 = vld [vmem:[#allocation2 + $0xf0] sm:$0xf] }
  0x18   :  { %v650_v22 = vor.u32 %v766_v20, %v649_v19  ;;  %v774_v23 = vld [vmem:[#allocation2 + $0x184] sm:$0xf0]  ;;  %v765_v25 = vld [vmem:[#allocation2 + $0xf4] sm:$0xf0]  ;;  %v677_v27 = vld [vmem:[#allocation2 + $0x170] sm:$0xf] }
  0x19   :  { %106 = vmatpush.bf16.msra.mxu0 %v574_v48  ;;  %119 = vmatpush.bf16.msra.mxu1 %v578_v49  ;;  %v682_v26 = vor.u32 %v774_v23, %v681_v21  ;;  %v773_v28 = vld [vmem:[#allocation2 + $0x174] sm:$0xf0]  ;;  %v646_v29 = vor.u32 %v765_v25, %v645_v24  ;;  %v641_v31 = vld [vmem:[#allocation2 + $0xe0] sm:$0xf]  ;;  %v764_v32 = vld [vmem:[#allocation2 + $0xe4] sm:$0xf0] }
  0x1a   :  { %192 = vmatpush.bf16.msra.mxu2 %v608_v52  ;;  %205 = vmatpush.bf16.msra.mxu3 %v612_v53  ;;  %v678_v30 = vor.u32 %v773_v28, %v677_v27  ;;  %v673_v33 = vld [vmem:[#allocation2 + $0x160] sm:$0xf]  ;;  %v772_v34 = vld [vmem:[#allocation2 + $0x164] sm:$0xf0]  ;;  %v642_v35 = vor.u32 %v764_v32, %v641_v31  ;;  %v637_v37 = vld [vmem:[#allocation2 + $0xd0] sm:$0xf] }
  0x1b   :  { %v674_v36 = vor.u32 %v772_v34, %v673_v33  ;;  %v763_v38 = vld [vmem:[#allocation2 + $0xd4] sm:$0xf0]  ;;  %v669_v39 = vld [vmem:[#allocation2 + $0x150] sm:$0xf]  ;;  %v633_v43 = vld [vmem:[#allocation2 + $0xc0] sm:$0xf] }
  0x1c   :  { %v771_v40 = vld [vmem:[#allocation2 + $0x154] sm:$0xf0]  ;;  %v638_v41 = vor.u32 %v763_v38, %v637_v37  ;;  %v762_v44 = vld [vmem:[#allocation2 + $0xc4] sm:$0xf0]  ;;  %v665_v45 = vld [vmem:[#allocation2 + $0x140] sm:$0xf] }
  0x1d   :  { %107 = vmatpush.bf16.msra.mxu0 %v566_v60  ;;  %120 = vmatpush.bf16.msra.mxu1 %v570_v61  ;;  %v670_v42 = vor.u32 %v771_v40, %v669_v39  ;;  %v770_v46 = vld [vmem:[#allocation2 + $0x144] sm:$0xf0]  ;;  %v634_v47 = vor.u32 %v762_v44, %v633_v43  ;;  %v726_v51 = vld [vmem:[#allocation2 + $0x230] sm:$0xf]  ;;  %v785_v52 = vld [vmem:[#allocation2 + $0x234] sm:$0xf0] }
  0x1e   :  { %193 = vmatpush.bf16.msra.mxu2 %v600_v62  ;;  %206 = vmatpush.bf16.msra.mxu3 %v604_v63  ;;  %v666_v48 = vor.u32 %v770_v46, %v665_v45  ;;  %v722_v53 = vld [vmem:[#allocation2 + $0x220] sm:$0xf]  ;;  %v727_v54 = vor.u32 %v785_v52, %v726_v51  ;;  %v784_v55 = vld [vmem:[#allocation2 + $0x224] sm:$0xf0]  ;;  %v718_v1 = vld [vmem:[#allocation2 + $0x210] sm:$0xf] }
  0x1f   :  { %v723_v60 = vor.u32 %v784_v55, %v722_v53  ;;  %v783_v2 = vld [vmem:[#allocation2 + $0x214] sm:$0xf0]  ;;  %v782_v31 = vld [vmem:[#allocation2 + $0x204] sm:$0xf0]  ;;  %v710_v33 = vld [vmem:[#allocation2 + $0x1f0] sm:$0xf] }
  0x20   :  { %595 = vmatmul.msk.bf16.vlgmr.msra.gmra.mxu0 %vm87_vm1, %v32_v0  ;;  %596 = vmatmul.msk.bf16.vlgmr.msra.gmra.mxu1 %vm87_vm1, %v32_v0  ;;  %v719_v5 = vor.u32 %v783_v2, %v718_v1  ;;  %v781_v34 = vld [vmem:[#allocation2 + $0x1f4] sm:$0xf0]  ;;  %v780_v37 = vld [vmem:[#allocation2 + $0x1e4] sm:$0xf0]  ;;  %v702_v39 = vld [vmem:[#allocation2 + $0x1d0] sm:$0xf] }
  0x21   :  { %629 = vmatmul.msk.bf16.vlgmr.msra.gmra.mxu2 %vm87_vm1, %v32_v0  ;;  %630 = vmatmul.msk.bf16.vlgmr.msra.gmra.mxu3 %vm87_vm1, %v32_v0  ;;  %v779_v40 = vld [vmem:[#allocation2 + $0x1d4] sm:$0xf0]  ;;  %v778_v43 = vld [vmem:[#allocation2 + $0x1c4] sm:$0xf0]  ;;  %v795_v45 = vld [vmem:[%s903_s2] ss:$0 sm:$0xff] }
  0x22   :  { %374 = vmatpush.bf16.msrb.mxu0 %v662_v4  ;;  %387 = vmatpush.bf16.msrb.mxu1 %v694_v6  ;;  %v787_v1 = vld [vmem:[#allocation2 + $0x254] sm:$0xf0]  ;;  %vm527_vm8 = vcmask 523264   ;;  %s862_s25 = smov [#allocation5]   ;;  %s553_s29 = sshll.u32 %s904_s3, 4  ;;  %vm544_vm9 = vcmask 25600   ;;  %s554_s29 = int_to_ptr.hbm [resolvable:$true] %s553_s29 }
  0x23   :  { %473 = vmatpush.bf16.msrb.mxu2 %v727_v54  ;;  %s551_s26 = sshll.u32 %s862_s25, 4  ;;  %s552_s26 = int_to_ptr.vmem [resolvable:$true] %s551_s26 }
  0x26   :  { %375 = vmatpush.bf16.msrb.mxu0 %v658_v10  ;;  %388 = vmatpush.bf16.msrb.mxu1 %v690_v12 }
  0x27   :  { %474 = vmatpush.bf16.msrb.mxu2 %v723_v60 }
  0x2a   :  { %376 = vmatpush.bf16.msrb.mxu0 %v654_v16  ;;  %389 = vmatpush.bf16.msrb.mxu1 %v686_v18 }
  0x2b   :  { %475 = vmatpush.bf16.msrb.mxu2 %v719_v5 }
  0x2e   :  { %377 = vmatpush.bf16.msrb.mxu0 %v650_v22  ;;  %390 = vmatpush.bf16.msrb.mxu1 %v682_v26 }
  0x32   :  { %378 = vmatpush.bf16.msrb.mxu0 %v646_v29  ;;  %391 = vmatpush.bf16.msrb.mxu1 %v678_v30  ;;  %v714_v30 = vld [vmem:[#allocation2 + $0x200] sm:$0xf] }
  0x33   :  { %v715_v32 = vor.u32 %v782_v31, %v714_v30 }
  0x35   :  { %476 = vmatpush.bf16.msrb.mxu2 %v715_v32 }
  0x36   :  { %379 = vmatpush.bf16.msrb.mxu0 %v642_v35  ;;  %392 = vmatpush.bf16.msrb.mxu1 %v674_v36  ;;  %v711_v35 = vor.u32 %v781_v34, %v710_v33  ;;  %v706_v36 = vld [vmem:[#allocation2 + $0x1e0] sm:$0xf] }
  0x37   :  { %v707_v38 = vor.u32 %v780_v37, %v706_v36 }
  0x39   :  { %477 = vmatpush.bf16.msrb.mxu2 %v711_v35 }
  0x3a   :  { %380 = vmatpush.bf16.msrb.mxu0 %v638_v41  ;;  %393 = vmatpush.bf16.msrb.mxu1 %v670_v42  ;;  %v703_v41 = vor.u32 %v779_v40, %v702_v39  ;;  %v698_v42 = vld [vmem:[#allocation2 + $0x1c0] sm:$0xf] }
  0x3b   :  { %v699_v44 = vor.u32 %v778_v43, %v698_v42 }
  0x3d   :  { %478 = vmatpush.bf16.msrb.mxu2 %v707_v38 }
  0x3e   :  { %381 = vmatpush.bf16.msrb.mxu0 %v634_v47  ;;  %394 = vmatpush.bf16.msrb.mxu1 %v666_v48 }
  0x41   :  { %479 = vmatpush.bf16.msrb.mxu2 %v703_v41 }
  0x45   :  { %480 = vmatpush.bf16.msrb.mxu2 %v699_v44 }
  0x9d   :  { %v109_v49 = vpop.f32.mrf.mxu0  ;;  %v122_v50 = vpop.f32.mrf.mxu1 }
  0x9e   :  { %v212_v56 = vmul.f32 %v109_v49, %v109_v49  ;;  %v213_v57 = vmul.f32 %v122_v50, %v122_v50 }
  0xa4   :  { %v195_v58 = vpop.f32.mrf.mxu2  ;;  %v208_v59 = vpop.f32.mrf.mxu3 }
  0xa5   :  { %v214_v61 = vmul.f32 %v195_v58, %v195_v58  ;;  %v215_v62 = vmul.f32 %v208_v59, %v208_v59  ;;  %v111_v63 = vpop.f32.mrf.mxu0  ;;  %v124_v0 = vpop.f32.mrf.mxu1  ;;  %v743_v58 = vld [vmem:[#allocation2 + $0x270] sm:$0xf]  ;;  %v789_v59 = vld [vmem:[#allocation2 + $0x274] sm:$0xf0] }
  0xa6   :  { %v744_v60 = vor.u32 %v789_v59, %v743_v58  ;;  %v735_v0 = vld [vmem:[#allocation2 + $0x250] sm:$0xf] }
  0xa7   :  { %v216_v3 = vadd.f32 %v214_v61, %v212_v56  ;;  %v217_v4 = vadd.f32 %v215_v62, %v213_v57  ;;  %v739_v61 = vld [vmem:[#allocation2 + $0x260] sm:$0xf]  ;;  %v788_v62 = vld [vmem:[#allocation2 + $0x264] sm:$0xf0]  ;;  %v736_v2 = vor.u32 %v787_v1, %v735_v0 }
  0xa8   :  { %535 = vmatpush.bf16.msrb.mxu3 %v744_v60  ;;  %v740_v63 = vor.u32 %v788_v62, %v739_v61 }
  0xa9   :  { %798 = vrsqrt.f32 %v216_v3  ;;  %vm225_vm2 = vcmp.eq.f32.partialorder %v216_v3, inf  ;;  %v228_v21 = vand.u32 2147483648, %v216_v3  ;;  %vm227_vm3 = vcmp.eq.f32.partialorder %v216_v3, 0.0 }
  0xaa   :  { %800 = vrsqrt.f32 %v217_v4  ;;  %vm237_vm4 = vcmp.eq.f32.partialorder %v217_v4, inf  ;;  %v240_v24 = vand.u32 2147483648, %v217_v4  ;;  %vm239_vm5 = vcmp.eq.f32.partialorder %v217_v4, 0.0 }
  0xac   :  { %v197_v6 = vpop.f32.mrf.mxu2  ;;  %v210_v7 = vpop.f32.mrf.mxu3  ;;  %536 = vmatpush.bf16.msrb.mxu3 %v740_v63 }
  0xad   :  { %v796_v6 = vld [vmem:[%s903_s2 + $0x1] ss:$0 sm:$0xff] }
  0xaf   :  { %v799_v8 = vpop.eup %798 }
  0xb0   :  { %v801_v9 = vpop.eup %800  ;;  %v219_v10 = vmul.f32 %v799_v8, %v216_v3  ;;  %537 = vmatpush.bf16.msrb.mxu3 %v736_v2 }
  0xb1   :  { %v231_v11 = vmul.f32 %v801_v9, %v217_v4 }
  0xb2   :  { %v220_v12 = vmul.f32 %v799_v8, %v219_v10 }
  0xb3   :  { %v232_v13 = vmul.f32 %v801_v9, %v231_v11 }
  0xb4   :  { %v221_v14 = vmul.f32 0.5, %v220_v12 }
  0xb5   :  { %v233_v15 = vmul.f32 0.5, %v232_v13 }
  0xb6   :  { %v222_v16 = vsub.f32 1.5, %v221_v14 }
  0xb7   :  { %v234_v17 = vsub.f32 1.5, %v233_v15 }
  0xb8   :  { %v223_v18 = vmul.f32 %v799_v8, %v222_v16  ;;  %v797_v16 = vld [vmem:[%s903_s2 + $0x2] ss:$0 sm:$0xff] }
  0xb9   :  { %v235_v19 = vmul.f32 %v801_v9, %v234_v17 }
  0xba   :  { %v224_v20 = vmul.f32 %v223_v18, %v216_v3 }
  0xbb   :  { %v236_v22 = vmul.f32 %v235_v19, %v217_v4 }
  0xbc   :  { %v226_v23 = vsel %vm225_vm2, %v216_v3, %v224_v20  ;;  %v731_v3 = vld [vmem:[#allocation2 + $0x240] sm:$0xf] }
  0xbd   :  { %v229_v25 = vsel %vm227_vm3, %v228_v21, %v226_v23  ;;  %v238_v26 = vsel %vm237_vm4, %v217_v4, %v236_v22  ;;  %v786_v4 = vld [vmem:[#allocation2 + $0x244] sm:$0xf0] }
  0xbe   :  { %v242_v27 = vpack.c.bf16 %v229_v25, %v229_v25  ;;  %v241_v28 = vsel %vm239_vm5, %v240_v24, %v238_v26  ;;  %v732_v5 = vor.u32 %v786_v4, %v731_v3 }
  0xbf   :  { %v243_v29 = vpack.c.bf16 %v241_v28, %v241_v28 }
  0xc0   :  { %382 = vmatmul.bf16.vlgmr.msrb.gmra.mxu0 %v242_v27  ;;  %538 = vmatpush.bf16.msrb.mxu3 %v732_v5 }
  0xc1   :  { %395 = vmatmul.bf16.vlgmr.msrb.gmra.mxu1 %v243_v29 }
 0x13d   :  { %v383_v46 = vpop.f32.mrf.mxu0 }
 0x13e   :  { %v384_v47 = vadd.f32 %v795_v45, %v383_v46  ;;  %v396_v48 = vpop.f32.mrf.mxu1 }
 0x140   :  { %v397_v49 = vadd.f32 %v396_v48, %v384_v47 }
 0x142   :  { %v401_v50 = vmin.f32 %v397_v49, 0.0  ;;  %vm400_vm6 = vcmp.gt.f32.partialorder %v397_v49, 0.0 }
 0x144   :  { %v402_v51 = vmul.f32 1.442695, %v401_v50 }
 0x145   :  { %v385_v52 = vpop.f32.mrf.mxu0 }
 0x146   :  { %802 = vpow2.f32 %v402_v51  ;;  %v398_v53 = vpop.f32.mrf.mxu1 }
 0x14c   :  { %v803_v54 = vpop.eup %802 }
 0x14d   :  { %v695_v55 = vadd.f32 -1.0, %v803_v54 }
 0x14f   :  { %v405_v56 = vsel %vm400_vm6, %v397_v49, %v695_v55 }
 0x150   :  { %v406_v57 = vpack.c.bf16 %v405_v56, %v405_v56 }
 0x152   :  { %481 = vmatmul.bf16.vlgmr.msrb.gmra.mxu2 %v406_v57 }
 0x1d5   :  { %v482_v7 = vpop.f32.mrf.mxu2 }
 0x1d6   :  { %v483_v8 = vadd.f32 %v796_v6, %v482_v7 }
 0x1d8   :  { %v487_v9 = vmin.f32 %v483_v8, 0.0  ;;  %vm486_vm7 = vcmp.gt.f32.partialorder %v483_v8, 0.0 }
 0x1da   :  { %v488_v10 = vmul.f32 1.442695, %v487_v9 }
 0x1dc   :  { %804 = vpow2.f32 %v488_v10 }
 0x1dd   :  { %v484_v11 = vpop.f32.mrf.mxu2 }
 0x1e2   :  { %v805_v12 = vpop.eup %804 }
 0x1e3   :  { %v728_v13 = vadd.f32 -1.0, %v805_v12 }
 0x1e5   :  { %v491_v14 = vsel %vm486_vm7, %v483_v8, %v728_v13 }
 0x1e6   :  { %v492_v15 = vpack.c.bf16 %v491_v14, %v491_v14 }
 0x1e8   :  { %745 = vmatmul.msk.bf16.vlgmr.msrb.gmra.mxu3 %vm527_vm8, %v492_v15 }
 0x26b   :  { %v540_v17 = vpop.f32.mrf.mxu3 }
 0x26c   :  { %v541_v18 = vadd.f32 %v797_v16, %v540_v17 }
 0x26e   :  { %545 = vst.msk [vmem:[#allocation5] sm:$0x3] %vm544_vm9, %v541_v18 }
 0x26f   :  { %556 = dma.vmem_to_hbm [thread:$0]  %s552_s26, 32, %s554_s29, [#allocation4]  }
 0x273   :  { %v542_v19 = vpop.f32.mrf.mxu3 }
 0x274   :  { %856 = dma.done.wait [#allocation4], 32  }
 0x275   :  { %857 = vsyncadd [#allocation4], 4294967264 }
 0x276   :  { %561 = vsyncpa [#allocation3], 1 }
 0x277   :  { %562 = vsyncpa [#allocation4], 1 }

</bundles_post_ra>
